<compile_context>
chip_gen: v6e
topology: v6e:2x2x1
jax: 0.10.0
libtpu: 0.0.40
codegen_flags: <defaults>
</compile_context>

<pallas_src>
import functools

import jax
import jax.numpy as jnp
from jax import lax
from jax.experimental import pallas as pl
from jax.experimental.pallas import tpu as pltpu

_LANES = 128
# ~2 MiB of logits per input per pipeline buffer (4096x128 rows in f32).
# 2 inputs x 2 pipeline buffers x 2 MiB = 8 MiB of input buffers; with the
# f32 accumulator and elementwise-chain spills the peak stays well under the
# 32 MiB scoped limit (and v7x's 64 MiB physical VMEM).
_TILE_BYTES = 2 * 1024 * 1024


def _softplus(x):
    # jax.nn.softplus == logaddexp(x, 0): one exp + one log1p per element,
    # numerically stable for large |x|.
    return jax.nn.softplus(x)


def _make_loss_kernel(loss_type, *, n_valid, tile_r, blocks_per_split,
                      last_block, needs_mask):
    """Per-split partial sum of (term_real + term_fake) over its row tiles."""

    def kernel(real_ref, fake_ref, out_ref, acc_ref):
        p = pl.program_id(0)          # "parallel" split axis (megacore on v7x)
        i = pl.program_id(1)          # "arbitrary" streaming / reduction axis

        @pl.when(i == 0)
        def _init():
            acc_ref[...] = jnp.zeros_like(acc_ref)

        real = real_ref[...].astype(jnp.float32)
        fake = fake_ref[...].astype(jnp.float32)

        if loss_type == "hinge":
            term = jnp.maximum(1.0 - real, 0.0) + jnp.maximum(1.0 + fake, 0.0)
        elif loss_type == "vanilla":
            # TODO(synk): on v7x this path can become EUP-bound; bf16 exp/log1p
            # would relieve it at some precision cost (kept f32 for parity).
            term = _softplus(-real) + _softplus(fake)
        elif loss_type == "wgan-gp":
            term = fake - real
        else:
            raise ValueError(f"Unknown GAN loss '{loss_type}'.")

        if not needs_mask:
            acc_ref[...] += term            # pure VPU, hides under the DMA
        else:
            gb = p * blocks_per_split + i   # un-clamped global block index

            @pl.when(gb < last_block)
            def _hot():                     # interior tiles: no mask work
                acc_ref[...] += term

            @pl.when(gb >= last_block)
            def _tail():
                # Last real block (ragged rows / lane padding) and any clamped
                # duplicate block: drop every element whose flat index >= n.
                row = gb * tile_r + lax.broadcasted_iota(
                    jnp.int32, (tile_r, _LANES), 0)
                col = lax.broadcasted_iota(jnp.int32, (tile_r, _LANES), 1)
                keep = row * _LANES + col < n_valid
                acc_ref[...] += jnp.where(keep, term, 0.0)

        @pl.when(i == pl.num_programs(1) - 1)
        def _finalize():
            # One cross-lane/sublane reduce per split, broadcast into the
            # lane-dense (1, 8, 128) output block (wrapper reads [., 0, 0]).
            out_ref[...] = jnp.sum(acc_ref[...]) * jnp.ones(
                (1, 8, _LANES), jnp.float32)

    return kernel


def _as_slab(x, rows):
    """View x as a lane-dense (rows, 128) slab.

    Free (pure reshape) when x.size == rows * 128; otherwise pads with at most
    127 zeros — padded entries are masked out in-kernel, so the pad value is
    irrelevant (safe for any logits dtype, including fp8).
    """
    flat = jnp.ravel(x)
    total = rows * _LANES
    if flat.size != total:
        flat = jnp.pad(flat, (0, total - flat.size))
    return flat.reshape(rows, _LANES)


def _run_loss_kernel(real_logits, fake_logits, loss_type, max_tile_rows=None):
    """0.5 * (mean(term_real) + mean(term_fake)) via a streamed Pallas reduction."""
    n = int(real_logits.size)
    rows = pl.cdiv(n, _LANES)

    itemsize = max(jnp.dtype(real_logits.dtype).itemsize,
                   jnp.dtype(fake_logits.dtype).itemsize)
    if max_tile_rows is None:
        # Round to 32 rows so sub-32-bit dtypes (bf16: 16, int8/fp8: 32) keep
        # full sublane packing in multi-block tiles.
        max_tile_rows = max(32, (_TILE_BYTES // (_LANES * itemsize)) // 32 * 32)

    if rows <= max_tile_rows:
        tile_r = rows                       # single block == full array dims
    else:
        tile_r = max(8, (max_tile_rows // 8) * 8)

    num_blocks = pl.cdiv(rows, tile_r)
    last_block = num_blocks - 1
    # Two independent partial sums -> both TensorCores on v7x via the
    # "parallel" grid axis; a no-op on single-core v5e/v6e.
    n_split = 2 if num_blocks >= 2 else 1
    blocks_per_split = pl.cdiv(num_blocks, n_split)
    coverage = n_split * blocks_per_split * tile_r * _LANES
    needs_mask = coverage != n

    real2d = _as_slab(real_logits, rows)
    fake2d = _as_slab(fake_logits, rows)

    def in_idx(p, i):
        # Clamp so a possible trailing duplicate block stays in bounds; its
        # contribution is zeroed by the in-kernel mask.
        return (jnp.minimum(p * blocks_per_split + i, last_block), 0)

    kernel = _make_loss_kernel(
        loss_type, n_valid=n, tile_r=tile_r,
        blocks_per_split=blocks_per_split, last_block=last_block,
        needs_mask=needs_mask)

    flops_per_pair = {"hinge": 6, "vanilla": 10, "wgan-gp": 2}[loss_type] + 1
    cost = pl.CostEstimate(
        flops=flops_per_pair * coverage,
        transcendentals=4 * coverage if loss_type == "vanilla" else 0,
        bytes_accessed=(coverage
                        * (real2d.dtype.itemsize + fake2d.dtype.itemsize)
                        + n_split * 8 * _LANES * 4),
    )

    partials = pl.pallas_call(
        kernel,
        out_shape=jax.ShapeDtypeStruct((n_split, 8, _LANES), jnp.float32),
        grid_spec=pltpu.PrefetchScalarGridSpec(
            num_scalar_prefetch=0,
            grid=(n_split, blocks_per_split),
            in_specs=[
                pl.BlockSpec((tile_r, _LANES), in_idx),
                pl.BlockSpec((tile_r, _LANES), in_idx),
            ],
            out_specs=pl.BlockSpec((1, 8, _LANES), lambda p, i: (p, 0, 0)),
            scratch_shapes=[pltpu.VMEM((tile_r, _LANES), jnp.float32)],
        ),
        compiler_params=pltpu.CompilerParams(
            dimension_semantics=("parallel", "arbitrary"),
            vmem_limit_bytes=32 * 1024 * 1024,
        ),
        cost_estimate=cost,
    )(real2d, fake2d)

    return jnp.sum(partials[:, 0, 0]) * jnp.float32(0.5 / n)


@functools.partial(jax.jit, static_argnames=("disc_start", "disc_factor",
                                             "disc_loss_type"))
def discriminator_loss(real_logits, fake_logits, global_step,
                       disc_start=2001, disc_factor=1.0,
                       disc_loss_type="hinge"):
    """JAX/Pallas equivalent of DiscriminatorLoss.forward."""
    if disc_loss_type not in ("hinge", "vanilla", "wgan-gp"):
        raise ValueError(f"Unknown GAN loss '{disc_loss_type}'.")
    if not (disc_factor is not None and disc_factor > 0.0):
        return jnp.float32(0.0)
    assert real_logits.shape == fake_logits.shape, "logit shapes must match"

    def _active():
        return jnp.float32(disc_factor) * _run_loss_kernel(
            real_logits, fake_logits, disc_loss_type)

    def _warmup():
        return jnp.float32(0.0)

    # adopt_weight: skip the kernel (and its HBM reads) during warm-up steps.
    return lax.cond(jnp.asarray(global_step) >= disc_start, _active, _warmup)


def _reference_loss(real, fake, global_step, disc_start=2001,
                    disc_factor=1.0, disc_loss_type="hinge"):
    real = real.astype(jnp.float32)
    fake = fake.astype(jnp.float32)
    if disc_loss_type == "hinge":
        d = 0.5 * (jnp.mean(jax.nn.relu(1.0 - real))
                   + jnp.mean(jax.nn.relu(1.0 + fake)))
    elif disc_loss_type == "vanilla":
        d = 0.5 * (jnp.mean(jax.nn.softplus(-real))
                   + jnp.mean(jax.nn.softplus(fake)))
    else:
        d = 0.5 * (-jnp.mean(real) + jnp.mean(fake))
    w = 0.0 if global_step < disc_start else disc_factor
    return w * d


if __name__ == "__main__":
    key = jax.random.PRNGKey(0)
    failures = []

    def _check(name, got, want, rtol, atol):
        got = float(jax.block_until_ready(got))
        want = float(want)
        if not abs(got - want) <= atol + rtol * abs(want):
            failures.append(f"{name}: got={got} want={want}")

    # Public API at small shapes (lane-aligned and ragged), warm-up + active.
    for shape in [(2, 1, 16, 16), (2, 1, 15, 15)]:
        key, kr, kf = jax.random.split(key, 3)
        real = jax.random.normal(kr, shape, dtype=jnp.float32)
        fake = jax.random.normal(kf, shape, dtype=jnp.float32)
        for step in (100, 3000):
            for lt in ("hinge", "vanilla", "wgan-gp"):
                got = discriminator_loss(real, fake, step, disc_loss_type=lt)
                want = _reference_loss(real, fake, step, disc_loss_type=lt)
                _check(f"api{shape} step={step} {lt}", got, want, 1e-5, 2e-6)

    # Multi-block / 2-way-split / ragged-tail code paths: a small tile override
    # keeps the shapes tiny while exercising the same paths as large inputs.
    cases = [((2, 2, 64, 64), 32),      # 4 blocks: even 2-way split, no mask
             ((2, 1, 50, 50), 16),      # 3 blocks: clamped duplicate + tail mask
             ((2, 2, 128, 128), None)]  # default tiling, single big block
    for shape, mtr in cases:
        key, kr, kf = jax.random.split(key, 3)
        real = jax.random.normal(kr, shape, dtype=jnp.float32)
        fake = jax.random.normal(kf, shape, dtype=jnp.float32)
        for lt in ("hinge", "vanilla", "wgan-gp"):
            run = jax.jit(functools.partial(_run_loss_kernel, loss_type=lt,
                                            max_tile_rows=mtr))
            got = run(real, fake)
            want = _reference_loss(real, fake, 3000, disc_loss_type=lt)
            _check(f"kernel{shape} tile={mtr} {lt}", got, want, 1e-4, 2e-6)

    if failures:
        for f in failures:
            print("MISMATCH", f)
    else:
        print("KERNEL_OK")
</pallas_src>

<mosaic_0001>
module attributes {stable_mosaic.version = 11 : i64} {
  func.func @kernel(%arg0: i32, %arg1: i32, %arg2: memref<4x128xf32, #tpu.memory_space<vmem>>, %arg3: memref<4x128xf32, #tpu.memory_space<vmem>>, %arg4: memref<1x8x128xf32, #tpu.memory_space<vmem>>, %arg5: memref<4x128xf32, #tpu.memory_space<vmem>>) attributes {dimension_semantics = [#tpu.dimension_semantics<parallel>, #tpu.dimension_semantics<arbitrary>], iteration_bounds = array<i64: 1, 1>, scalar_prefetch = 0 : i64, scratch_operands = 1 : i64, tpu.core_type = #tpu.core_type<tc>, window_params = [{transform_indices = @transform_0, window_bounds = array<i64: 4, 128>}, {transform_indices = @transform_1, window_bounds = array<i64: 4, 128>}, {transform_indices = @transform_2, window_bounds = array<i64: 1, 8, 128>}]} {
    %c0_i32 = arith.constant 0 : i32
    %0 = arith.cmpi eq, %arg1, %c0_i32 : i32
    %1 = arith.extui %0 : i1 to i32
    %c0_i32_0 = arith.constant 0 : i32
    %2 = arith.cmpi ne, %1, %c0_i32_0 : i32
    scf.if %2 {
      %cst_13 = arith.constant 0.000000e+00 : f32
      %20 = vector.broadcast %cst_13 : f32 to vector<4x128xf32>
      %c0_14 = arith.constant 0 : index
      %c0_15 = arith.constant 0 : index
      %21 = vector.load %arg5[%c0_14, %c0_15] : memref<4x128xf32, #tpu.memory_space<vmem>>, vector<4x128xf32>
      tpu.vector_store %arg5[%c0_14, %c0_15], %20 {strides = array<i32>} : memref<4x128xf32, #tpu.memory_space<vmem>>, vector<4x128xf32>,
    } else {
    }
    %c0 = arith.constant 0 : index
    %c0_1 = arith.constant 0 : index
    %3 = vector.load %arg2[%c0, %c0_1] : memref<4x128xf32, #tpu.memory_space<vmem>>, vector<4x128xf32>
    %c0_2 = arith.constant 0 : index
    %c0_3 = arith.constant 0 : index
    %4 = vector.load %arg3[%c0_2, %c0_3] : memref<4x128xf32, #tpu.memory_space<vmem>>, vector<4x128xf32>
    %cst = arith.constant 1.000000e+00 : f32
    %5 = vector.broadcast %cst : f32 to vector<4x128xf32>
    %6 = arith.subf %5, %3 : vector<4x128xf32>
    %cst_4 = arith.constant 0.000000e+00 : f32
    %7 = vector.broadcast %cst_4 : f32 to vector<4x128xf32>
    %8 = arith.maximumf %6, %7 : vector<4x128xf32>
    %cst_5 = arith.constant 1.000000e+00 : f32
    %9 = vector.broadcast %cst_5 : f32 to vector<4x128xf32>
    %10 = arith.addf %9, %4 : vector<4x128xf32>
    %cst_6 = arith.constant 0.000000e+00 : f32
    %11 = vector.broadcast %cst_6 : f32 to vector<4x128xf32>
    %12 = arith.maximumf %10, %11 : vector<4x128xf32>
    %13 = arith.addf %8, %12 : vector<4x128xf32>
    %c0_7 = arith.constant 0 : index
    %c0_8 = arith.constant 0 : index
    %14 = vector.load %arg5[%c0_7, %c0_8] : memref<4x128xf32, #tpu.memory_space<vmem>>, vector<4x128xf32>
    %15 = arith.addf %14, %13 : vector<4x128xf32>
    %c0_9 = arith.constant 0 : index
    %c0_10 = arith.constant 0 : index
    %16 = vector.load %arg5[%c0_9, %c0_10] : memref<4x128xf32, #tpu.memory_space<vmem>>, vector<4x128xf32>
    tpu.vector_store %arg5[%c0_9, %c0_10], %15 {strides = array<i32>} : memref<4x128xf32, #tpu.memory_space<vmem>>, vector<4x128xf32>,
    %c0_i32_11 = arith.constant 0 : i32
    %17 = arith.cmpi eq, %arg1, %c0_i32_11 : i32
    %18 = arith.extui %17 : i1 to i32
    %c0_i32_12 = arith.constant 0 : i32
    %19 = arith.cmpi ne, %18, %c0_i32_12 : i32
    scf.if %19 {
      %c0_13 = arith.constant 0 : index
      %c0_14 = arith.constant 0 : index
      %20 = vector.load %arg5[%c0_13, %c0_14] : memref<4x128xf32, #tpu.memory_space<vmem>>, vector<4x128xf32>
      %21 = vector.shape_cast %20 : vector<4x128xf32> to vector<1x4x128xf32>
      %cst_15 = arith.constant dense<0.000000e+00> : vector<1xf32>
      %22 = vector.multi_reduction <add>, %21, %cst_15 [1, 2] : vector<1x4x128xf32> to vector<1xf32>
      %23 = vector.shape_cast %22 : vector<1xf32> to vector<1x1x1xf32>
      %24 = vector.extract %23[0, 0, 0] : f32 from vector<1x1x1xf32>
      %cst_16 = arith.constant 1.000000e+00 : f32
      %25 = vector.broadcast %cst_16 : f32 to vector<1x8x128xf32>
      %26 = vector.broadcast %24 : f32 to vector<1x8x128xf32>
      %27 = arith.mulf %26, %25 : vector<1x8x128xf32>
      %c0_17 = arith.constant 0 : index
      %c0_18 = arith.constant 0 : index
      %c0_19 = arith.constant 0 : index
      %28 = vector.load %arg4[%c0_17, %c0_18, %c0_19] : memref<1x8x128xf32, #tpu.memory_space<vmem>>, vector<1x8x128xf32>
      tpu.vector_store %arg4[%c0_17, %c0_18, %c0_19], %27 {strides = array<i32>} : memref<1x8x128xf32, #tpu.memory_space<vmem>>, vector<1x8x128xf32>,
    } else {
    }
    return
  }
  func.func @transform_0(%arg0: i32, %arg1: i32) -> (i32, i32) {
    %c1_i32 = arith.constant 1 : i32
    %0 = arith.muli %arg0, %c1_i32 : i32
    %1 = arith.addi %0, %arg1 : i32
    %c0_i32 = arith.constant 0 : i32
    %2 = arith.minsi %1, %c0_i32 : i32
    %c0_i32_0 = arith.constant 0 : i32
    %c0_i32_1 = arith.constant 0 : i32
    return %2, %c0_i32_0 : i32, i32
  }
  func.func @transform_1(%arg0: i32, %arg1: i32) -> (i32, i32) {
    %c1_i32 = arith.constant 1 : i32
    %0 = arith.muli %arg0, %c1_i32 : i32
    %1 = arith.addi %0, %arg1 : i32
    %c0_i32 = arith.constant 0 : i32
    %2 = arith.minsi %1, %c0_i32 : i32
    %c0_i32_0 = arith.constant 0 : i32
    %c0_i32_1 = arith.constant 0 : i32
    return %2, %c0_i32_0 : i32, i32
  }
  func.func @transform_2(%arg0: i32, %arg1: i32) -> (i32, i32, i32) {
    %c0_i32 = arith.constant 0 : i32
    %c0_i32_0 = arith.constant 0 : i32
    %c0_i32_1 = arith.constant 0 : i32
    return %arg0, %c0_i32, %c0_i32_0 : i32, i32, i32
  }
}

</mosaic_0001>

<bundles_post_ra>
// kernel: branch_1_fun.1
= control target key start
LH: loop header
LB: loop body
LE: loop exit
PB: predicated region body
PF: predicated region fallthrough
CT: control target
= control target key end

     0   :  { %v116_v0 = vmov 0.0   ;;  %vm84_vm0 = vcmask 1043456   ;;  %s141_s0 = inlined_call_operand.vmem [shape: f32[4,128], index: 0, kind: input, shape index: {}]   ;;  %s142_s1 = inlined_call_operand.vmem [shape: f32[4,128], index: 1, kind: input, shape index: {}]   ;;  %s143_s2 = inlined_call_operand.vmem [shape: f32[1,8,128], index: 2, kind: output, shape index: {}]  }
   0x1   :  { %69 = vst [vmem:[#allocation2] sm:$0xf] %v116_v0  ;;  %v70_v1 = vld [vmem:[%s141_s0] sm:$0xf] }
   0x2   :  { %v71_v2 = vld [vmem:[%s142_s1] sm:$0xf]  ;;  %v72_v3 = vsub.f32 1.0, %v70_v1 }
   0x3   :  { %v74_v4 = vadd.f32 1.0, %v71_v2 }
   0x4   :  { %v73_v5 = vmax.f32 %v72_v3, 0.0 }
   0x5   :  { %v75_v6 = vmax.f32 %v74_v4, 0.0 }
   0x7   :  { %v76_v7 = vadd.f32 %v75_v6, %v73_v5 }
   0x8   :  { %v77_v8 = vld [vmem:[#allocation2] sm:$0xf] }
   0x9   :  { %v78_v9 = vadd.f32 %v77_v8, %v76_v7 }
   0xb   :  { %79 = vst [vmem:[#allocation2] sm:$0xf] %v78_v9 }
  0x12   :  { %v83_v10 = vld [vmem:[#allocation2] sm:$0xf] }
  0x13   :  { %v85_v11 = vsel %vm84_vm0, %v83_v10, 0.0 }
  0x14   :  { %86 = vadd.xlane.f32.xlu0 %v85_v11 }
  0x9d   :  { %v87_v12 = vpop.xlane.xlu0 %86 }
  0x9e   :  { %v88_v13 = vrot.slane %v87_v12, 4 }
  0xa0   :  { %v89_v14 = vadd.f32 %v88_v13, %v87_v12 }
  0xa2   :  { %v90_v15 = vrot.slane %v89_v14, 2 }
  0xa4   :  { %v91_v16 = vadd.f32 %v90_v15, %v89_v14 }
  0xa6   :  { %v92_v17 = vrot.slane %v91_v16, 1 }
  0xa8   :  { %v93_v18 = vadd.f32 %v92_v17, %v91_v16 }
  0xaa   :  { %113 = vpush %v93_v18 }
  0xdb   :  { %s114_s0 = spop %113 }
  0xdc   :  { %v95_v19 = vstv %s114_s0 }
  0xdd   :  { %96 = vst [vmem:[%s143_s2] sm:$0xff] %v95_v19 }

</bundles_post_ra>
